<compile_context>
chip_gen: v5e
topology: v5e:2x2
jax: 0.10.0
libtpu: 0.0.40
codegen_flags: <defaults>
</compile_context>

<pallas_src>
import jax
import jax.numpy as jnp
from jax import lax
from jax.experimental import pallas as pl
from jax.experimental.pallas import tpu as pltpu

N_DIGITS = 4                     # n in the PyTorch module
N_CLASSES = 10
C = N_DIGITS * N_CLASSES         # 40 logit columns per sample
NUM_CORES = 2                    # leading "parallel" axis (2 TCs on v7x)
TL_MAX = 8192                    # column tile (multiple of 128)
LANE = 128


def _round_up(x, m):
    return ((x + m - 1) // m) * m


def n_cross_entropy_loss(output, label):
    """output: (B, 10*n) float logits, label: (B, n) int -> scalar f32 loss."""
    B, c_in = output.shape
    assert c_in == C
    assert label.shape == (B, N_DIGITS)

    # --- lane-dense, batch-major layout (samples on the 128-lane axis) ------
    B_pad = _round_up(B, LANE)
    logits_t = jnp.zeros((C, B_pad), jnp.float32)
    logits_t = logits_t.at[:, :B].set(output.astype(jnp.float32).T)
    labels_t = jnp.zeros((8, B_pad), jnp.int32)          # pad 4 label rows to 8
    labels_t = labels_t.at[:N_DIGITS, :B].set(label.astype(jnp.int32).T)

    TL = min(TL_MAX, B_pad)          # lane tile (multiple of 128)
    NT = pl.cdiv(B_pad, TL)          # logical number of column tiles
    NC = min(NUM_CORES, NT)          # never spawn a "core" with no real tile
    T = pl.cdiv(NT, NC)              # tiles handled per core

    def idx(c, t):
        # Clamp so out-of-range logical tiles (odd NT split over 2 cores) map
        # to a valid block; their compute is skipped inside the kernel.
        return (0, jnp.minimum(c * T + t, NT - 1))

    def kernel(lg_ref, lb_ref, out_ref, acc_ref):
        t = pl.program_id(1)
        lt = pl.program_id(0) * pl.num_programs(1) + t   # unclamped logical tile

        @pl.when(t == 0)
        def _():
            acc_ref[...] = jnp.zeros_like(acc_ref)

        @pl.when(lt * TL < B)        # skip duplicated / fully past-the-end tiles
        def _():
            lg = lg_ref[...]                              # (40, TL) f32
            lb = lb_ref[...]                              # (8, TL)  i32, rows 0..3 used

            # Shared per-sample max over all 40 classes (cancels exactly in the
            # log-sum-exp); axis-0 reduce = cross-vreg maxes + 8-sublane reduce.
            m = jnp.max(lg, axis=0, keepdims=True)        # (1, TL)
            e = jnp.exp(lg - m)                           # (40, TL) lane-dense EUP

            # Per-group sum-of-exp via one small MXU matmul with an (8, 40)
            # group indicator (rows 4..7 duplicate groups 0..3 -> no log(0);
            # the duplicate factor is folded back with the 0.5 below).
            g_io = lax.broadcasted_iota(jnp.int32, (8, C), 0)
            r_io = lax.broadcasted_iota(jnp.int32, (8, C), 1)
            g_mod = jnp.where(g_io >= N_DIGITS, g_io - N_DIGITS, g_io)
            in_grp = (r_io >= g_mod * N_CLASSES) & (r_io < (g_mod + 1) * N_CLASSES)
            ind = jnp.where(in_grp, jnp.float32(1.0), jnp.float32(0.0))   # (8, 40)
            s = jnp.dot(ind, e, preferred_element_type=jnp.float32)        # (8, TL)
            lse_sum = (0.5 * jnp.sum(jnp.log(s), axis=0, keepdims=True)
                       + m * N_DIGITS)                                      # (1, TL)

            # Label-logit select: 4 independent compares OR'd (no dependent
            # where-chain), then one cheap axis-0 (sublane) sum.
            row = lax.broadcasted_iota(jnp.int32, (C, TL), 0)               # (40, TL)
            onehot = row == lb[0:1, :]
            for g in range(1, N_DIGITS):
                onehot = onehot | (row == (lb[g:g + 1, :] + N_CLASSES * g))
            sel = jnp.sum(jnp.where(onehot, lg, 0.0), axis=0, keepdims=True)

            # Mask pad / ragged columns past the true batch size.
            col = lax.broadcasted_iota(jnp.int32, (1, TL), 1)
            valid = (lt * TL + col) < B
            acc_ref[...] += jnp.where(valid, lse_sum - sel, 0.0)

        @pl.when(t == pl.num_programs(1) - 1)
        def _():
            out_ref[...] = jnp.broadcast_to(jnp.sum(acc_ref[...]), out_ref.shape)

    partials = pl.pallas_call(
        kernel,
        out_shape=jax.ShapeDtypeStruct((NC, 8, 128), jnp.float32),
        grid=(NC, T),
        in_specs=[
            pl.BlockSpec((C, TL), idx),
            pl.BlockSpec((8, TL), idx),
        ],
        out_specs=pl.BlockSpec((1, 8, 128), lambda c, t: (c, 0, 0)),
        scratch_shapes=[pltpu.VMEM((1, TL), jnp.float32)],
        compiler_params=pltpu.CompilerParams(
            dimension_semantics=("parallel", "arbitrary"),
            vmem_limit_bytes=32 * 1024 * 1024,
        ),
        cost_estimate=pl.CostEstimate(
            flops=int(B) * (2 * 8 * C + 12 * C),
            transcendentals=int(B) * (C + 8),
            bytes_accessed=int(B_pad) * 4 * (C + 8) + NC * 8 * 128 * 4,
        ),
    )(logits_t, labels_t)

    # Combine per-core partial sums; apply the mean normalization once.
    return jnp.sum(partials[:, 0, 0]) / jnp.float32(N_DIGITS * B)


def _reference(output, label):
    """Pure-JAX reference mirroring the PyTorch semantics."""
    B = output.shape[0]
    lg = output.reshape(B, N_DIGITS, N_CLASSES).astype(jnp.float32)
    lse = jax.scipy.special.logsumexp(lg, axis=-1)                     # (B, 4)
    sel = jnp.take_along_axis(lg, label[..., None].astype(jnp.int32),
                              axis=-1)[..., 0]                          # (B, 4)
    return jnp.mean(lse - sel)


if __name__ == "__main__":
    key = jax.random.PRNGKey(0)
    k1, k2 = jax.random.split(key)
    B = 2
    output = jax.random.normal(k1, (B, N_DIGITS * N_CLASSES), dtype=jnp.float32)
    label = jax.random.randint(k2, (B, N_DIGITS), 0, N_CLASSES, dtype=jnp.int32)

    loss = n_cross_entropy_loss(output, label)
    jax.block_until_ready(loss)

    ref = _reference(output, label)
    assert jnp.allclose(loss, ref, atol=1e-5, rtol=1e-5), (loss, ref)
    print("KERNEL_OK")
</pallas_src>

<mosaic_0001>
module attributes {stable_mosaic.version = 11 : i64} {
  func.func @kernel(%arg0: i32, %arg1: i32, %arg2: memref<40x128xf32, #tpu.memory_space<vmem>>, %arg3: memref<8x128xi32, #tpu.memory_space<vmem>>, %arg4: memref<1x8x128xf32, #tpu.memory_space<vmem>>, %arg5: memref<1x128xf32, #tpu.memory_space<vmem>>) attributes {dimension_semantics = [#tpu.dimension_semantics<parallel>, #tpu.dimension_semantics<arbitrary>], iteration_bounds = array<i64: 1, 1>, scalar_prefetch = 0 : i64, scratch_operands = 1 : i64, tpu.core_type = #tpu.core_type<tc>, window_params = [{transform_indices = @transform_0, window_bounds = array<i64: 40, 128>}, {transform_indices = @transform_1, window_bounds = array<i64: 8, 128>}, {transform_indices = @transform_2, window_bounds = array<i64: 1, 8, 128>}]} {
    %c1_i32 = arith.constant 1 : i32
    %0 = arith.muli %arg0, %c1_i32 : i32
    %1 = arith.addi %0, %arg1 : i32
    %c0_i32 = arith.constant 0 : i32
    %2 = arith.cmpi eq, %arg1, %c0_i32 : i32
    %3 = arith.extui %2 : i1 to i32
    %c0_i32_0 = arith.constant 0 : i32
    %4 = arith.cmpi ne, %3, %c0_i32_0 : i32
    scf.if %4 {
      %cst = arith.constant 0.000000e+00 : f32
      %12 = vector.broadcast %cst : f32 to vector<1x128xf32>
      %c0 = arith.constant 0 : index
      %c0_4 = arith.constant 0 : index
      %13 = vector.load %arg5[%c0, %c0_4] : memref<1x128xf32, #tpu.memory_space<vmem>>, vector<1x128xf32>
      tpu.vector_store %arg5[%c0, %c0_4], %12 {strides = array<i32>} : memref<1x128xf32, #tpu.memory_space<vmem>>, vector<1x128xf32>,
    } else {
    }
    %c128_i32 = arith.constant 128 : i32
    %5 = arith.muli %1, %c128_i32 : i32
    %c2_i32 = arith.constant 2 : i32
    %6 = arith.cmpi slt, %5, %c2_i32 : i32
    %7 = arith.extui %6 : i1 to i32
    %c0_i32_1 = arith.constant 0 : i32
    %8 = arith.cmpi ne, %7, %c0_i32_1 : i32
    scf.if %8 {
      %c0 = arith.constant 0 : index
      %c0_4 = arith.constant 0 : index
      %12 = vector.load %arg2[%c0, %c0_4] : memref<40x128xf32, #tpu.memory_space<vmem>>, vector<40x128xf32>
      %c0_5 = arith.constant 0 : index
      %c0_6 = arith.constant 0 : index
      %13 = vector.load %arg3[%c0_5, %c0_6] : memref<8x128xi32, #tpu.memory_space<vmem>>, vector<8x128xi32>
      %cst = arith.constant dense<0xFF800000> : vector<128xf32>
      %14 = vector.multi_reduction <maximumf>, %12, %cst [0] : vector<40x128xf32> to vector<128xf32>
      %15 = vector.shape_cast %14 : vector<128xf32> to vector<1x128xf32>
      %16 = vector.broadcast %15 : vector<1x128xf32> to vector<40x128xf32>
      %17 = arith.subf %12, %16 : vector<40x128xf32>
      %18 = math.exp %17 : vector<40x128xf32>
      %19 = tpu.iota {dimensions = array<i32: 0>} : vector<8x40xi32>
      %20 = tpu.iota {dimensions = array<i32: 1>} : vector<8x40xi32>
      %c4_i32 = arith.constant 4 : i32
      %21 = vector.broadcast %c4_i32 : i32 to vector<8x40xi32>
      %22 = arith.cmpi sge, %19, %21 : vector<8x40xi32>
      %c4_i32_7 = arith.constant 4 : i32
      %23 = vector.broadcast %c4_i32_7 : i32 to vector<8x40xi32>
      %24 = arith.subi %19, %23 : vector<8x40xi32>
      %25 = arith.select %22, %24, %19 : vector<8x40xi1>, vector<8x40xi32>
      %c10_i32 = arith.constant 10 : i32
      %26 = vector.broadcast %c10_i32 : i32 to vector<8x40xi32>
      %27 = arith.muli %25, %26 : vector<8x40xi32>
      %28 = arith.cmpi sge, %20, %27 : vector<8x40xi32>
      %c1_i32_8 = arith.constant 1 : i32
      %29 = vector.broadcast %c1_i32_8 : i32 to vector<8x40xi32>
      %30 = arith.addi %25, %29 : vector<8x40xi32>
      %c10_i32_9 = arith.constant 10 : i32
      %31 = vector.broadcast %c10_i32_9 : i32 to vector<8x40xi32>
      %32 = arith.muli %30, %31 : vector<8x40xi32>
      %33 = arith.cmpi slt, %20, %32 : vector<8x40xi32>
      %34 = arith.andi %28, %33 : vector<8x40xi1>
      %cst_10 = arith.constant 1.000000e+00 : f32
      %cst_11 = arith.constant 0.000000e+00 : f32
      %35 = vector.broadcast %cst_10 : f32 to vector<8x40xf32>
      %36 = vector.broadcast %cst_11 : f32 to vector<8x40xf32>
      %37 = arith.select %34, %35, %36 : vector<8x40xi1>, vector<8x40xf32>
      %cst_12 = arith.constant dense<0.000000e+00> : vector<8x128xf32>
      %38 = tpu.matmul %37, %18, %cst_12 {dimension_numbers = #tpu.dot_dimension_numbers<[1], [0], [0], [1], [0, 0, 1, 1], [], []>} : vector<8x40xf32>, vector<40x128xf32>, vector<8x128xf32> -> vector<8x128xf32>
      %39 = math.log %38 : vector<8x128xf32>
      %cst_13 = arith.constant dense<0.000000e+00> : vector<128xf32>
      %40 = vector.multi_reduction <add>, %39, %cst_13 [0] : vector<8x128xf32> to vector<128xf32>
      %41 = vector.shape_cast %40 : vector<128xf32> to vector<1x128xf32>
      %cst_14 = arith.constant 5.000000e-01 : f32
      %42 = vector.broadcast %cst_14 : f32 to vector<1x128xf32>
      %43 = arith.mulf %42, %41 : vector<1x128xf32>
      %cst_15 = arith.constant 4.000000e+00 : f32
      %44 = vector.broadcast %cst_15 : f32 to vector<1x128xf32>
      %45 = arith.mulf %15, %44 : vector<1x128xf32>
      %46 = arith.addf %43, %45 : vector<1x128xf32>
      %47 = tpu.iota {dimensions = array<i32: 0>} : vector<40x128xi32>
      %48 = vector.extract_strided_slice %13 {offsets = [0, 0], sizes = [1, 128], strides = [1, 1]} : vector<8x128xi32> to vector<1x128xi32>
      %49 = vector.broadcast %48 : vector<1x128xi32> to vector<40x128xi32>
      %50 = arith.cmpi eq, %47, %49 : vector<40x128xi32>
      %51 = vector.extract_strided_slice %13 {offsets = [1, 0], sizes = [1, 128], strides = [1, 1]} : vector<8x128xi32> to vector<1x128xi32>
      %c10_i32_16 = arith.constant 10 : i32
      %52 = vector.broadcast %c10_i32_16 : i32 to vector<1x128xi32>
      %53 = arith.addi %51, %52 : vector<1x128xi32>
      %54 = vector.broadcast %53 : vector<1x128xi32> to vector<40x128xi32>
      %55 = arith.cmpi eq, %47, %54 : vector<40x128xi32>
      %56 = arith.ori %50, %55 : vector<40x128xi1>
      %57 = vector.extract_strided_slice %13 {offsets = [2, 0], sizes = [1, 128], strides = [1, 1]} : vector<8x128xi32> to vector<1x128xi32>
      %c20_i32 = arith.constant 20 : i32
      %58 = vector.broadcast %c20_i32 : i32 to vector<1x128xi32>
      %59 = arith.addi %57, %58 : vector<1x128xi32>
      %60 = vector.broadcast %59 : vector<1x128xi32> to vector<40x128xi32>
      %61 = arith.cmpi eq, %47, %60 : vector<40x128xi32>
      %62 = arith.ori %56, %61 : vector<40x128xi1>
      %63 = vector.extract_strided_slice %13 {offsets = [3, 0], sizes = [1, 128], strides = [1, 1]} : vector<8x128xi32> to vector<1x128xi32>
      %c30_i32 = arith.constant 30 : i32
      %64 = vector.broadcast %c30_i32 : i32 to vector<1x128xi32>
      %65 = arith.addi %63, %64 : vector<1x128xi32>
      %66 = vector.broadcast %65 : vector<1x128xi32> to vector<40x128xi32>
      %67 = arith.cmpi eq, %47, %66 : vector<40x128xi32>
      %68 = arith.ori %62, %67 : vector<40x128xi1>
      %cst_17 = arith.constant 0.000000e+00 : f32
      %69 = vector.broadcast %cst_17 : f32 to vector<40x128xf32>
      %70 = arith.select %68, %12, %69 : vector<40x128xi1>, vector<40x128xf32>
      %cst_18 = arith.constant dense<0.000000e+00> : vector<128xf32>
      %71 = vector.multi_reduction <add>, %70, %cst_18 [0] : vector<40x128xf32> to vector<128xf32>
      %72 = vector.shape_cast %71 : vector<128xf32> to vector<1x128xf32>
      %73 = tpu.iota {dimensions = array<i32: 1>} : vector<1x128xi32>
      %c128_i32_19 = arith.constant 128 : i32
      %74 = arith.muli %1, %c128_i32_19 : i32
      %75 = vector.broadcast %74 : i32 to vector<1x128xi32>
      %76 = arith.addi %75, %73 : vector<1x128xi32>
      %c2_i32_20 = arith.constant 2 : i32
      %77 = vector.broadcast %c2_i32_20 : i32 to vector<1x128xi32>
      %78 = arith.cmpi slt, %76, %77 : vector<1x128xi32>
      %c0_21 = arith.constant 0 : index
      %c0_22 = arith.constant 0 : index
      %79 = vector.load %arg5[%c0_21, %c0_22] : memref<1x128xf32, #tpu.memory_space<vmem>>, vector<1x128xf32>
      %80 = arith.subf %46, %72 : vector<1x128xf32>
      %cst_23 = arith.constant 0.000000e+00 : f32
      %81 = vector.broadcast %cst_23 : f32 to vector<1x128xf32>
      %82 = arith.select %78, %80, %81 : vector<1x128xi1>, vector<1x128xf32>
      %83 = arith.addf %79, %82 : vector<1x128xf32>
      %c0_24 = arith.constant 0 : index
      %c0_25 = arith.constant 0 : index
      %84 = vector.load %arg5[%c0_24, %c0_25] : memref<1x128xf32, #tpu.memory_space<vmem>>, vector<1x128xf32>
      tpu.vector_store %arg5[%c0_24, %c0_25], %83 {strides = array<i32>} : memref<1x128xf32, #tpu.memory_space<vmem>>, vector<1x128xf32>,
    } else {
    }
    %c0_i32_2 = arith.constant 0 : i32
    %9 = arith.cmpi eq, %arg1, %c0_i32_2 : i32
    %10 = arith.extui %9 : i1 to i32
    %c0_i32_3 = arith.constant 0 : i32
    %11 = arith.cmpi ne, %10, %c0_i32_3 : i32
    scf.if %11 {
      %c0 = arith.constant 0 : index
      %c0_4 = arith.constant 0 : index
      %12 = vector.load %arg5[%c0, %c0_4] : memref<1x128xf32, #tpu.memory_space<vmem>>, vector<1x128xf32>
      %13 = vector.shape_cast %12 : vector<1x128xf32> to vector<1x1x128xf32>
      %cst = arith.constant dense<0.000000e+00> : vector<1xf32>
      %14 = vector.multi_reduction <add>, %13, %cst [1, 2] : vector<1x1x128xf32> to vector<1xf32>
      %15 = vector.shape_cast %14 : vector<1xf32> to vector<1x1x1xf32>
      %16 = vector.extract %15[0, 0, 0] : f32 from vector<1x1x1xf32>
      %17 = vector.broadcast %16 : f32 to vector<1x8x128xf32>
      %c0_5 = arith.constant 0 : index
      %c0_6 = arith.constant 0 : index
      %c0_7 = arith.constant 0 : index
      %18 = vector.load %arg4[%c0_5, %c0_6, %c0_7] : memref<1x8x128xf32, #tpu.memory_space<vmem>>, vector<1x8x128xf32>
      tpu.vector_store %arg4[%c0_5, %c0_6, %c0_7], %17 {strides = array<i32>} : memref<1x8x128xf32, #tpu.memory_space<vmem>>, vector<1x8x128xf32>,
    } else {
    }
    return
  }
  func.func @transform_0(%arg0: i32, %arg1: i32) -> (i32, i32) {
    %c1_i32 = arith.constant 1 : i32
    %0 = arith.muli %arg0, %c1_i32 : i32
    %1 = arith.addi %0, %arg1 : i32
    %c0_i32 = arith.constant 0 : i32
    %2 = arith.minsi %1, %c0_i32 : i32
    %c0_i32_0 = arith.constant 0 : i32
    %c0_i32_1 = arith.constant 0 : i32
    return %c0_i32_0, %2 : i32, i32
  }
  func.func @transform_1(%arg0: i32, %arg1: i32) -> (i32, i32) {
    %c1_i32 = arith.constant 1 : i32
    %0 = arith.muli %arg0, %c1_i32 : i32
    %1 = arith.addi %0, %arg1 : i32
    %c0_i32 = arith.constant 0 : i32
    %2 = arith.minsi %1, %c0_i32 : i32
    %c0_i32_0 = arith.constant 0 : i32
    %c0_i32_1 = arith.constant 0 : i32
    return %c0_i32_0, %2 : i32, i32
  }
  func.func @transform_2(%arg0: i32, %arg1: i32) -> (i32, i32, i32) {
    %c0_i32 = arith.constant 0 : i32
    %c0_i32_0 = arith.constant 0 : i32
    %c0_i32_1 = arith.constant 0 : i32
    return %arg0, %c0_i32, %c0_i32_0 : i32, i32, i32
  }
}

</mosaic_0001>

<bundles_post_ra>
// kernel: tpu_custom_call.1
= control target key start
LH: loop header
LB: loop body
LE: loop exit
PB: predicated region body
PF: predicated region fallthrough
CT: control target
= control target key end

     0   :  { %7 = vsyncpa [#allocation4], 0  ;;  %s469_s0 = inlined_call_operand.hbm [shape: f32[40,128], index: 0, kind: input, shape index: {}]   ;;  %s470_s1 = inlined_call_operand.hbm [shape: s32[8,128], index: 1, kind: input, shape index: {}]   ;;  %s471_s2 = inlined_call_operand.hbm [shape: f32[1,8,128], index: 2, kind: output, shape index: {}]  }
   0x1   :  { %8 = vsyncpa [#allocation7], 0 }
   0x2   :  { %9 = vsyncpa [#allocation5], 0  ;;  %s19_s11 = sshll.u32 %s469_s0, 4  ;;  %s357_s12 = smov [#allocation3]   ;;  %s20_s11 = int_to_ptr.hbm [resolvable:$true] %s19_s11 }
   0x3   :  { %s21_s13 = sshll.u32 %s357_s12, 4  ;;  %s38_s16 = sshll.u32 %s470_s1, 4  ;;  %s22_s13 = int_to_ptr.vmem [resolvable:$true] %s21_s13  ;;  %s39_s16 = int_to_ptr.hbm [resolvable:$true] %s38_s16 }
   0x4   :  { %s358_s17 = smov 128   ;;  %s359_s18 = smov 8  }
   0x5   :  { %27 = dma.hbm_to_vmem [thread:$0]  %s20_s11, 640, %s22_s13, [#allocation4], %s358_s17, %s358_s17, %s359_s18  }
   0x6   :  { %s360_s19 = smov [#allocation6]  }
   0x7   :  { %s40_s20 = sshll.u32 %s360_s19, 4  ;;  %s41_s20 = int_to_ptr.vmem [resolvable:$true] %s40_s20 }
   0x8   :  { %43 = dma.hbm_to_vmem [thread:$0]  %s39_s16, 128, %s41_s20, [#allocation7]  }
   0x9   :  { %351 = dma.done.wait [#allocation4], 640  }
   0xa   :  { %352 = vsyncadd [#allocation4], 4294966656 }
   0xb   :  { %353 = dma.done.wait [#allocation7], 128  }
   0xc   :  { %354 = vsyncadd [#allocation7], 4294967168  ;;  %v100_v0 = vlaneseq  ;;  %v387_v2 = vld [vmem:[#allocation3] sm:$0xff]  ;;  %v389_v3 = vld [vmem:[#allocation3 + $0x8] sm:$0xff]  ;;  %v361_v22 = vmov 0.0   ;;  %v476_v30 = vmov 0 }
   0xd   :  { %v391_v4 = vld [vmem:[#allocation3 + $0x10] sm:$0xff]  ;;  %v393_v5 = vld [vmem:[#allocation3 + $0x18] sm:$0xff]  ;;  %v395_v6 = vld [vmem:[#allocation3 + $0x20] sm:$0xff]  ;;  %63 = vst [vmem:[#allocation2] sm:$0x1] %v361_v22  ;;  %s362_s0 = smov [#allocation8]  }
   0xe   :  { %v385_v1 = vshrl.u32 %v100_v0, 7  ;;  %v74_v7 = vld [vmem:[#allocation6] sm:$0xff]  ;;  %v75_v9 = vmax.f32 %v387_v2, %v395_v6  ;;  %v77_v10 = vmax.f32 %v391_v4, %v393_v5  ;;  %v103_v57 = vand.u32 127, %v100_v0  ;;  %s240_s1 = sshll.u32 %s362_s0, 4  ;;  %s242_s23 = sshll.u32 %s471_s2, 4  ;;  %s241_s1 = int_to_ptr.vmem [resolvable:$true] %s240_s1  ;;  %s243_s23 = int_to_ptr.hbm [resolvable:$true] %s242_s23 }
   0xf   :  { %v153_v11 = vperm.slane %v74_v7, 0  ;;  %v159_v12 = vadd.s32 10, %v74_v7  ;;  %v171_v14 = vadd.s32 20, %v74_v7  ;;  %v183_v19 = vadd.s32 30, %v74_v7 }
  0x10   :  { %v149_v8 = vadd.s32 8, %v385_v1  ;;  %v150_v13 = vadd.s32 16, %v385_v1  ;;  %v76_v15 = vmax.f32 %v75_v9, %v389_v3  ;;  %v151_v16 = vadd.s32 24, %v385_v1 }
  0x11   :  { %v152_v17 = vadd.s32 32, %v385_v1  ;;  %vm154_vm0 = vcmp.eq.s32.totalorder %v385_v1, %v153_v11  ;;  %v160_v18 = vperm.slane %v159_v12, 1  ;;  %v172_v21 = vperm.slane %v171_v14, 2 }
  0x12   :  { %v78_v20 = vmax.f32 %v76_v15, %v77_v10  ;;  %vm155_vm1 = vcmp.eq.s32.totalorder %v149_v8, %v153_v11  ;;  %vm156_vm2 = vcmp.eq.s32.totalorder %v150_v13, %v153_v11  ;;  %vm157_vm6 = vcmp.eq.s32.totalorder %v151_v16, %v153_v11 }
  0x13   :  { %vm161_vm3 = vcmp.eq.s32.totalorder %v385_v1, %v160_v18  ;;  %vm162_vm4 = vcmp.eq.s32.totalorder %v149_v8, %v160_v18  ;;  %vm163_vm5 = vcmp.eq.s32.totalorder %v150_v13, %v160_v18  ;;  %vm164_vm7 = vcmp.eq.s32.totalorder %v151_v16, %v160_v18 }
  0x14   :  { %v79_v23 = vrot.slane %v78_v20, 4  ;;  %vm166_vm8 = vmor %vm154_vm0, %vm161_vm3  ;;  %vm158_vm9 = vcmp.eq.s32.totalorder %v152_v17, %v153_v11  ;;  %vm165_vm10 = vcmp.eq.s32.totalorder %v152_v17, %v160_v18  ;;  %vm173_vm13 = vcmp.eq.s32.totalorder %v385_v1, %v172_v21 }
  0x15   :  { %vm167_vm11 = vmor %vm155_vm1, %vm162_vm4  ;;  %vm174_vm15 = vcmp.eq.s32.totalorder %v149_v8, %v172_v21  ;;  %v184_v26 = vperm.slane %v183_v19, 3  ;;  %vm175_vm3 = vcmp.eq.s32.totalorder %v150_v13, %v172_v21  ;;  %vm176_vm1 = vcmp.eq.s32.totalorder %v151_v16, %v172_v21 }
  0x16   :  { %v80_v24 = vmax.f32 %v78_v20, %v79_v23  ;;  %vm168_vm12 = vmor %vm156_vm2, %vm163_vm5  ;;  %vm177_vm2 = vcmp.eq.s32.totalorder %v152_v17, %v172_v21  ;;  %v257_v31 = vadd.s32 4294967292, %v385_v1  ;;  %v213_v20 = vld [vmem:[#allocation2] sm:$0x1] }
  0x17   :  { %vm412_vm14 = vmor %vm157_vm6, %vm164_vm7  ;;  %vm185_vm7 = vcmp.eq.s32.totalorder %v385_v1, %v184_v26 }
  0x18   :  { %v81_v27 = vrot.slane %v80_v24, 2  ;;  %vm170_vm0 = vmor %vm158_vm9, %vm165_vm10  ;;  %vm104_vm10 = vcmp.ge.s32.totalorder %v385_v1, 4 }
  0x19   :  { %vm416_vm4 = vmor %vm166_vm8, %vm173_vm13  ;;  %vm186_vm8 = vcmp.eq.s32.totalorder %v149_v8, %v184_v26  ;;  %v106_v37 = vsel %vm104_vm10, %v257_v31, %v385_v1 }
  0x1a   :  { %v82_v29 = vmax.f32 %v80_v24, %v81_v27  ;;  %vm179_vm5 = vmor %vm167_vm11, %vm174_vm15  ;;  %vm187_vm11 = vcmp.eq.s32.totalorder %v150_v13, %v184_v26  ;;  %v109_v52 = vadd.s32 1, %v106_v37  ;;  %v107_v58 = vmul.u32 10, %v106_v37 }
  0x1b   :  { %vm420_vm6 = vmor %vm168_vm12, %vm175_vm3  ;;  %vm188_vm12 = vcmp.eq.s32.totalorder %v151_v16, %v184_v26  ;;  %vm189_vm3 = vcmp.eq.s32.totalorder %v152_v17, %v184_v26 }
  0x1c   :  { %v477_v30 = vsel %vm420_vm6, 4294967295, %v476_v30  ;;  %v83_v32 = vrot.slane %v82_v29, 1  ;;  %vm428_vm9 = vmor %vm412_vm14, %vm176_vm1  ;;  %v110_v59 = vmul.u32 10, %v109_v52 }
  0x1d   :  { %vm433_vm13 = vmor %vm170_vm0, %vm177_vm2  ;;  %vm482_vm14 = vnez %v477_v30  ;;  %vm108_vm2 = vcmp.ge.s32.totalorder %v103_v57, %v107_v58 }
  0x1e   :  { %v437_v35 = vmax.f32 %v82_v29, %v83_v32  ;;  %vm190_vm15 = vmor %vm416_vm4, %vm185_vm7  ;;  %vm114_vm7 = vcmask 326656  }
  0x1f   :  { %vm191_vm6 = vmor %vm179_vm5, %vm186_vm8  ;;  %v195_v36 = vsel %vm190_vm15, %v387_v2, 0.0  ;;  %vm111_vm5 = vcmp.lt.s32.totalorder %v103_v57, %v110_v59  ;;  %vm222_vm8 = vcmask 1040384  }
  0x20   :  { %v89_v38 = vsub.f32 %v395_v6, %v437_v35  ;;  %vm192_vm0 = vmor %vm482_vm14, %vm187_vm11  ;;  %v196_v39 = vsel %vm191_vm6, %v389_v3, 0.0  ;;  %v88_v40 = vsub.f32 %v393_v5, %v437_v35  ;;  %v87_v41 = vsub.f32 %v391_v4, %v437_v35 }
  0x21   :  { %vm193_vm1 = vmor %vm428_vm9, %vm188_vm12  ;;  %v197_v42 = vsel %vm192_vm0, %v391_v4, 0.0  ;;  %v200_v43 = vadd.f32 %v196_v39, %v195_v36  ;;  %v86_v44 = vsub.f32 %v389_v3, %v437_v35  ;;  %v85_v48 = vsub.f32 %v387_v2, %v437_v35 }
  0x22   :  { %v98_v45 = vmul.f32 1.442695, %v89_v38  ;;  %vm194_vm4 = vmor %vm433_vm13, %vm189_vm3  ;;  %v198_v46 = vsel %vm193_vm1, %v393_v5, 0.0  ;;  %v96_v47 = vmul.f32 1.442695, %v88_v40  ;;  %v147_v16 = vmul.f32 4.0, %v437_v35 }
  0x23   :  { %v199_v49 = vsel %vm194_vm4, %v395_v6, 0.0  ;;  %v201_v50 = vadd.f32 %v200_v43, %v197_v42  ;;  %v94_v51 = vmul.f32 1.442695, %v87_v41  ;;  %v92_v53 = vmul.f32 1.442695, %v86_v44  ;;  %vm112_vm6 = vmand %vm108_vm2, %vm111_vm5 }
  0x24   :  { %267 = vpow2.f32 %v98_v45  ;;  %v90_v55 = vmul.f32 1.442695, %v85_v48  ;;  %v113_v2 = vsel %vm112_vm6, 1.0, %v361_v22  ;;  %vm212_vm9 = vcmp.lt.s32.totalorder %v103_v57, 2 }
  0x25   :  { %v202_v54 = vadd.f32 %v201_v50, %v198_v46  ;;  %269 = vpow2.f32 %v96_v47 }
  0x26   :  { %271 = vpow2.f32 %v94_v51 }
  0x27   :  { %v203_v56 = vadd.f32 %v202_v54, %v199_v49  ;;  %273 = vpow2.f32 %v92_v53 }
  0x28   :  { %275 = vpow2.f32 %v90_v55 }
  0x29   :  { %v204_v3 = vrot.slane %v203_v56, 4 }
  0x2a   :  { %v268_v60 = vpop.eup %267 }
  0x2b   :  { %v270_v61 = vpop.eup %269  ;;  %129 = vmatpush.msra.mxu0 %v268_v60  ;;  %v205_v4 = vadd.f32 %v204_v3, %v203_v56 }
  0x2c   :  { %v272_v62 = vpop.eup %271 }
  0x2d   :  { %130 = vmatpush.msra.mxu0 %v270_v61  ;;  %v274_v63 = vpop.eup %273  ;;  %v206_v7 = vrot.slane %v205_v4, 2 }
  0x2e   :  { %v276_v1 = vpop.eup %275 }
  0x2f   :  { %131 = vmatpush.msra.mxu0 %v272_v62  ;;  %v207_v10 = vadd.f32 %v206_v7, %v205_v4 }
  0x31   :  { %132 = vmatpush.msra.mxu0 %v274_v63  ;;  %v208_v13 = vrot.slane %v207_v10, 1 }
  0x33   :  { %133 = vmatpush.msra.mxu0 %v276_v1  ;;  %v209_v17 = vadd.f32 %v208_v13, %v207_v10 }
  0x34   :  { %258 = vmatmul.msk.f32.vlgmr.msra.gmra.mxu0 %vm114_vm7, %v113_v2 }
  0xb1   :  { %v135_v0 = vpop.f32.mrf.mxu0 }
  0xb2   :  { %277 = vlog2.f32 %v135_v0 }
  0xb8   :  { %v278_v5 = vpop.eup %277 }
  0xb9   :  { %v139_v6 = vmul.f32 0.6931472, %v278_v5 }
  0xbb   :  { %v140_v8 = vrot.slane %v139_v6, 4 }
  0xbd   :  { %v141_v9 = vadd.f32 %v140_v8, %v139_v6 }
  0xbf   :  { %v142_v11 = vrot.slane %v141_v9, 2 }
  0xc1   :  { %v143_v12 = vadd.f32 %v142_v11, %v141_v9 }
  0xc3   :  { %v144_v14 = vrot.slane %v143_v12, 1 }
  0xc5   :  { %v145_v15 = vadd.f32 %v144_v14, %v143_v12 }
  0xc7   :  { %v146_v18 = vmul.f32 0.5, %v145_v15 }
  0xc9   :  { %v148_v19 = vadd.f32 %v147_v16, %v146_v18 }
  0xcb   :  { %v214_v21 = vsub.f32 %v148_v19, %v209_v17 }
  0xcd   :  { %v215_v22 = vsel %vm212_vm9, %v214_v21, 0.0 }
  0xce   :  { %v216_v23 = vadd.f32 %v215_v22, %v213_v20 }
  0xd0   :  { %217 = vst [vmem:[#allocation2] sm:$0x1] %v216_v23 }
  0xd7   :  { %v221_v24 = vld [vmem:[#allocation2] sm:$0x1] }
  0xd8   :  { %v223_v25 = vsel %vm222_vm8, %v221_v24, 0.0 }
  0xd9   :  { %224 = vadd.xlane.f32.xlu0 %v223_v25 }
 0x14c   :  { %v225_v26 = vpop.xlane.xlu0 %224 }
 0x14d   :  { %v226_v27 = vrot.slane %v225_v26, 4 }
 0x14f   :  { %v227_v28 = vadd.f32 %v226_v27, %v225_v26 }
 0x151   :  { %v228_v29 = vrot.slane %v227_v28, 2 }
 0x153   :  { %v229_v30 = vadd.f32 %v228_v29, %v227_v28 }
 0x155   :  { %v230_v31 = vrot.slane %v229_v30, 1 }
 0x157   :  { %v231_v32 = vadd.f32 %v230_v31, %v229_v30 }
 0x159   :  { %259 = vpush %v231_v32 }
 0x18a   :  { %s260_s24 = spop %259 }
 0x18b   :  { %v233_v33 = vstv %s260_s24 }
 0x18c   :  { %234 = vst [vmem:[#allocation8] sm:$0xff] %v233_v33 }
 0x18d   :  { %245 = dma.vmem_to_hbm [thread:$0]  %s241_s1, 128, %s243_s23, [#allocation5]  }
 0x18e   :  { %355 = dma.done.wait [#allocation5], 128  }
 0x18f   :  { %356 = vsyncadd [#allocation5], 4294967168 }
 0x190   :  { %250 = vsyncpa [#allocation4], 1 }
 0x191   :  { %251 = vsyncpa [#allocation7], 1 }
 0x192   :  { %252 = vsyncpa [#allocation5], 1 }

</bundles_post_ra>
